<compile_context>
chip_gen: v7x
topology: tpu7x:2x2x1
jax: 0.10.0
libtpu: 0.0.40
codegen_flags: <defaults>
</compile_context>

<pallas_src>
import functools

import jax
import jax.numpy as jnp
from jax.experimental import pallas as pl
from jax.experimental.pallas import tpu as pltpu

NEG_SLOPE = 0.15


def _downconv_kernel(x_ref, w_ref, b_ref, o_ref):
    # x_ref: (K, tm)   w_ref: (Cout, K)   b_ref: (Cout, 1)   o_ref: (Cout, tm)
    acc = jnp.dot(w_ref[...], x_ref[...], preferred_element_type=jnp.float32)
    acc = acc + b_ref[...]                              # bias broadcast over lanes
    out = jnp.where(acc > 0, acc, NEG_SLOPE * acc)      # LeakyReLU(0.15)
    o_ref[...] = out.astype(o_ref.dtype)


def _choose_tile_m(Mn, K, Cout, dtype_bytes, n_batch):
    # Per grid step (double-buffered in + out): ~2*(K + Cout)*tm*dtype_bytes VMEM.
    # Big lane-dense tiles (>=512 lanes ~ 85% of HBM roofline) while staying far
    # inside v5e's 16 MiB scoped-VMEM default (v6e/v7x: 32 MiB).
    vmem_budget = 4 * 1024 * 1024
    tm = vmem_budget // (2 * (K + Cout) * dtype_bytes)
    tm = min(tm, 8192)                      # no measurable gain past a few K lanes
    # Keep >= 2 grid blocks total so both TensorCores get work even when N == 1.
    target = Mn if n_batch >= 2 else pl.cdiv(Mn, 2)
    tm = min(tm, pl.cdiv(target, 128) * 128)
    tm = max(128, (tm // 128) * 128)        # lane-aligned
    return tm


@functools.partial(jax.jit, static_argnames=("stride",))
def downsampling_conv_block(x, weight, bias, stride=2):
    """Forward of DownsamplingConvBlock (normalization='none', LeakyReLU(0.15)).

    x: (N, Cin, D, H, W); weight: (Cout, Cin, k, k, k) with k == stride;
    bias: (Cout,).  Returns (N, Cout, D//k, H//k, W//k).
    """
    k = stride
    N, Cin, D, H, W = x.shape
    Cout = weight.shape[0]
    Do, Ho, Wo = D // k, H // k, W // k
    Mn = Do * Ho * Wo
    K = Cin * k * k * k

    # --- glue: Xt = (N, K, Mn).  One XLA transpose pass (contraction axes are
    # interleaved with output axes in NCDHW memory order; unavoidable in a GEMM
    # formulation without in-kernel relayout).
    xp = x.reshape(N, Cin, Do, k, Ho, k, Wo, k)
    xt = jnp.transpose(xp, (0, 1, 3, 5, 7, 2, 4, 6)).reshape(N, K, Mn)

    w_mat = weight.reshape(Cout, K)          # already (Cout, K): no transpose
    b_col = bias.reshape(Cout, 1)

    dtype_bytes = jnp.dtype(x.dtype).itemsize
    tm = _choose_tile_m(Mn, K, Cout, dtype_bytes, N)
    Mp = pl.cdiv(Mn, tm) * tm
    if Mp != Mn:                             # tail-pad the lane axis (static)
        xt = jnp.pad(xt, ((0, 0), (0, 0), (0, Mp - Mn)))

    yt = pl.pallas_call(
        _downconv_kernel,
        out_shape=jax.ShapeDtypeStruct((N, Cout, Mp), x.dtype),
        grid_spec=pltpu.PrefetchScalarGridSpec(
            num_scalar_prefetch=0,
            grid=(N, Mp // tm),
            in_specs=[
                pl.BlockSpec((None, K, tm), lambda n, m: (n, 0, m)),   # lane-dense Xt tile
                pl.BlockSpec((Cout, K), lambda n, m: (0, 0)),          # whole weight (tiny)
                pl.BlockSpec((Cout, 1), lambda n, m: (0, 0)),          # bias column
            ],
            out_specs=pl.BlockSpec((None, Cout, tm), lambda n, m: (n, 0, m)),  # lane-dense
        ),
        compiler_params=pltpu.CompilerParams(
            dimension_semantics=("parallel", "parallel"),
        ),
    )(xt, w_mat, b_col)

    if Mp != Mn:
        yt = yt[:, :, :Mn]
    # Free reshape straight to the module's NCDHW output (no output transpose).
    return yt.reshape(N, Cout, Do, Ho, Wo)


def _reference(x, weight, bias, stride=2):
    # Pure-JAX reference: conv3d (kernel=stride, padding=0) + LeakyReLU(0.15)
    y = jax.lax.conv_general_dilated(
        x, weight,
        window_strides=(stride, stride, stride),
        padding="VALID",
        dimension_numbers=("NCDHW", "OIDHW", "NCDHW"),
    )
    y = y + bias.reshape(1, -1, 1, 1, 1)
    return jnp.where(y > 0, y, NEG_SLOPE * y)


if __name__ == "__main__":
    key = jax.random.PRNGKey(0)
    k_x, k_w, k_b = jax.random.split(key, 3)

    n_filters_in, n_filters_out, stride = 4, 8, 2
    N, D, H, W = 2, 16, 16, 16

    x = jax.random.normal(k_x, (N, n_filters_in, D, H, W), dtype=jnp.float32)
    weight = jax.random.normal(
        k_w, (n_filters_out, n_filters_in, stride, stride, stride),
        dtype=jnp.float32) * 0.1
    bias = jax.random.normal(k_b, (n_filters_out,), dtype=jnp.float32) * 0.1

    out = downsampling_conv_block(x, weight, bias, stride=stride)
    out = jax.block_until_ready(out)

    ref = _reference(x, weight, bias, stride=stride)
    assert out.shape == (N, n_filters_out, D // stride, H // stride, W // stride)
    assert jnp.allclose(out, ref, atol=1e-4, rtol=1e-4), "mismatch vs reference"

    print("KERNEL_OK")
</pallas_src>

<mosaic_0001>
module attributes {stable_mosaic.version = 11 : i64} {
  func.func @_downconv_kernel(%arg0: i32, %arg1: i32, %arg2: memref<1x32x512xf32, #tpu.memory_space<vmem>>, %arg3: memref<8x32xf32, #tpu.memory_space<vmem>>, %arg4: memref<8x1xf32, #tpu.memory_space<vmem>>, %arg5: memref<1x8x512xf32, #tpu.memory_space<vmem>>) attributes {dimension_semantics = [#tpu.dimension_semantics<parallel>, #tpu.dimension_semantics<parallel>], iteration_bounds = array<i64: 2, 1>, scalar_prefetch = 0 : i64, scratch_operands = 0 : i64, tpu.core_type = #tpu.core_type<tc>, window_params = [{transform_indices = @transform_0, window_bounds = array<i64: 1, 32, 512>}, {pipeline_mode = #tpu.pipeline_mode<synchronous>, transform_indices = @transform_1, window_bounds = array<i64: 8, 32>}, {pipeline_mode = #tpu.pipeline_mode<synchronous>, transform_indices = @transform_2, window_bounds = array<i64: 8, 1>}, {transform_indices = @transform_3, window_bounds = array<i64: 1, 8, 512>}]} {
    %c0 = arith.constant 0 : index
    %c0_0 = arith.constant 0 : index
    %0 = vector.load %arg3[%c0, %c0_0] : memref<8x32xf32, #tpu.memory_space<vmem>>, vector<8x32xf32>
    %c0_1 = arith.constant 0 : index
    %c0_2 = arith.constant 0 : index
    %c0_3 = arith.constant 0 : index
    %1 = vector.load %arg2[%c0_1, %c0_2, %c0_3] : memref<1x32x512xf32, #tpu.memory_space<vmem>>, vector<1x32x512xf32>
    %2 = vector.shape_cast %1 : vector<1x32x512xf32> to vector<32x512xf32>
    %cst = arith.constant dense<0.000000e+00> : vector<8x512xf32>
    %3 = tpu.matmul %0, %2, %cst {dimension_numbers = #tpu.dot_dimension_numbers<[1], [0], [0], [1], [0, 0, 1, 1], [], []>} : vector<8x32xf32>, vector<32x512xf32>, vector<8x512xf32> -> vector<8x512xf32>
    %c0_4 = arith.constant 0 : index
    %c0_5 = arith.constant 0 : index
    %4 = vector.load %arg4[%c0_4, %c0_5] : memref<8x1xf32, #tpu.memory_space<vmem>>, vector<8x1xf32>
    %5 = vector.broadcast %4 : vector<8x1xf32> to vector<8x512xf32>
    %6 = arith.addf %3, %5 : vector<8x512xf32>
    %cst_6 = arith.constant 0.000000e+00 : f32
    %7 = vector.broadcast %cst_6 : f32 to vector<8x512xf32>
    %8 = arith.cmpf ogt, %6, %7 : vector<8x512xf32>
    %cst_7 = arith.constant 1.500000e-01 : f32
    %9 = vector.broadcast %cst_7 : f32 to vector<8x512xf32>
    %10 = arith.mulf %9, %6 : vector<8x512xf32>
    %11 = arith.select %8, %6, %10 : vector<8x512xi1>, vector<8x512xf32>
    %c0_8 = arith.constant 0 : index
    %c0_9 = arith.constant 0 : index
    %c0_10 = arith.constant 0 : index
    %12 = vector.load %arg5[%c0_8, %c0_9, %c0_10] : memref<1x8x512xf32, #tpu.memory_space<vmem>>, vector<1x8x512xf32>
    %13 = vector.shape_cast %12 : vector<1x8x512xf32> to vector<8x512xf32>
    %14 = vector.shape_cast %11 : vector<8x512xf32> to vector<1x8x512xf32>
    tpu.vector_store %arg5[%c0_8, %c0_9, %c0_10], %14 {strides = array<i32>} : memref<1x8x512xf32, #tpu.memory_space<vmem>>, vector<1x8x512xf32>,
    return
  }
  func.func @transform_0(%arg0: i32, %arg1: i32) -> (i32, i32, i32) {
    %c0_i32 = arith.constant 0 : i32
    %c0_i32_0 = arith.constant 0 : i32
    return %arg0, %c0_i32, %arg1 : i32, i32, i32
  }
  func.func @transform_1(%arg0: i32, %arg1: i32) -> (i32, i32) {
    %c0_i32 = arith.constant 0 : i32
    %c0_i32_0 = arith.constant 0 : i32
    %c0_i32_1 = arith.constant 0 : i32
    return %c0_i32, %c0_i32_0 : i32, i32
  }
  func.func @transform_2(%arg0: i32, %arg1: i32) -> (i32, i32) {
    %c0_i32 = arith.constant 0 : i32
    %c0_i32_0 = arith.constant 0 : i32
    %c0_i32_1 = arith.constant 0 : i32
    return %c0_i32, %c0_i32_0 : i32, i32
  }
  func.func @transform_3(%arg0: i32, %arg1: i32) -> (i32, i32, i32) {
    %c0_i32 = arith.constant 0 : i32
    %c0_i32_0 = arith.constant 0 : i32
    return %arg0, %c0_i32, %arg1 : i32, i32, i32
  }
}

</mosaic_0001>

<bundles_post_ra>
// kernel: downsampling_conv_block.1
= control target key start
LH: loop header
LB: loop body
LE: loop exit
PB: predicated region body
PF: predicated region fallthrough
CT: control target
= control target key end

     0   :  { %s586_s12 = smov 0   ;;  %s588_s13 = smov 0   ;;  %s629_s0 = inlined_call_operand.vmem [shape: f32[2,32,512], index: 0, kind: input, shape index: {}]   ;;  %s630_s1 = inlined_call_operand.vmem [shape: f32[8,32], index: 1, kind: input, shape index: {}]   ;;  %s631_s2 = inlined_call_operand.vmem [shape: f32[8,1], index: 2, kind: input, shape index: {}]   ;;  %s632_s3 = inlined_call_operand.vmem [shape: f32[2,8,512], index: 3, kind: output, shape index: {}]  }
   0x1   :  { %s590_s14 = smov 0  }
   0x2 LB: > { %s25_s15 = sadd.s32 1, %s558_s13  ;;  %p486_p0 = scmp.ge.s32.totalorder %s562_s14, 1  ;;  %s562_s14 = sphi %s590_s14, %s13_s14   ;;  %s558_s13 = sphi %s588_s13, %s634_s13   ;;  %s554_s12 = sphi %s586_s12, %s633_s12  }
   0x3   : > { %p27_p1 = scmp.ge.s32.totalorder %s25_s15, 2  ;;  %p158_p2 = scmp.lt.s32.totalorder %s562_s14, 3 }
   0x5   : > { %s636_s15 = smov (%p27_p1, %s25_s15), 0  ;;  %p159_p3 = pnand %p486_p0, %p158_p2 }
   0x6   : > { %p191_p4 = scmp.lt.s32.totalorder (!%p159_p3), %s554_s12, 1  ;;  %v227_v0 = vld [vmem:[%s631_s2] sm:$0xff] (!%p159_p3)  ;;  %v564_v1 = vmov (!%p159_p3), 0.0   ;;  %v565_v2 = vmov (!%p159_p3), 0   ;;  %vm233_vm0 = vcmask (!%p159_p3), 261120  }
   0x7   : > { %162 = sbr.rel (%p159_p3) target bundleno = 249 (0xf9), region = 32  ;;  %301 = vmatprep.mubr.f32.mxu0 (!%p159_p3), %v564_v1  ;;  %372 = vmatprep.mubr.f32.mxu1 (!%p159_p3), %v564_v1  ;;  %v210_v27 = vld [vmem:[%s630_s1] sm:$0xff] (!%p159_p3) }
   0x8   : > { %539 = vset.pattern.permute.xlu0 (!%p159_p3), %v565_v2 }
   0x9   : > { %230 = vperm.xlu0 (!%p159_p3), %539, %v227_v0  }
   0xe   : > { %s638_s12 = smov (!%p191_p4, %s554_s12), 1 }
   0xf   : > { %s495_s18 = sshll.u32 %s638_s12, 7  ;;  %s496_s24 = sshll.u32 %s638_s12, 5 }
  0x10   : > { %s198_s21 = scalar_lea.vmem %s629_s0, %s495_s18  ;;  %s208_s27 = scalar_lea.vmem %s632_s3, %s496_s24 }
  0x11   : > { %v212_v3 = vld [vmem:[%s198_s21 + $0x8] sm:$0xff]  ;;  %v214_v5 = vld [vmem:[%s198_s21 + $0x18] sm:$0xff]  ;;  %v211_v8 = vld [vmem:[%s198_s21] sm:$0xff] }
  0x12   : > { %v216_v4 = vld [vmem:[%s198_s21 + $0x28] sm:$0xff]  ;;  %v218_v7 = vld [vmem:[%s198_s21 + $0x38] sm:$0xff]  ;;  %v215_v9 = vld [vmem:[%s198_s21 + $0x20] sm:$0xff] }
  0x13   : > { %v497_v6 = vpack.c.bf16 %v216_v4, %v212_v3  ;;  %v505_v10 = vpack.c.bf16 %v218_v7, %v214_v5  ;;  %v499_v11 = vpack.c.bf16 %v215_v9, %v211_v8  ;;  %v213_v12 = vld [vmem:[%s198_s21 + $0x10] sm:$0xff]  ;;  %v220_v14 = vld [vmem:[%s198_s21 + $0x48] sm:$0xff]  ;;  %v222_v17 = vld [vmem:[%s198_s21 + $0x58] sm:$0xff] }
  0x14   : > { %v217_v13 = vld [vmem:[%s198_s21 + $0x30] sm:$0xff]  ;;  %v224_v16 = vld [vmem:[%s198_s21 + $0x68] sm:$0xff]  ;;  %v226_v18 = vld [vmem:[%s198_s21 + $0x78] sm:$0xff] }
  0x15   : > { %498 = vmatprep.subr.bf16.mxu0 %v497_v6  ;;  %v507_v15 = vpack.c.bf16 %v217_v13, %v213_v12  ;;  %506 = vmatprep.subr.bf16.mxu1 %v505_v10  ;;  %v501_v19 = vpack.c.bf16 %v224_v16, %v220_v14  ;;  %v509_v20 = vpack.c.bf16 %v226_v18, %v222_v17  ;;  %v219_v21 = vld [vmem:[%s198_s21 + $0x40] sm:$0xff]  ;;  %v221_v23 = vld [vmem:[%s198_s21 + $0x50] sm:$0xff] }
  0x16   : > { %500 = vmatpush1.bf16.msra.mxu0 %v499_v11  ;;  %v223_v22 = vld [vmem:[%s198_s21 + $0x60] sm:$0xff]  ;;  %v225_v25 = vld [vmem:[%s198_s21 + $0x70] sm:$0xff] }
  0x17   : > { %508 = vmatpush1.bf16.msra.mxu1 %v507_v15  ;;  %v503_v24 = vpack.c.bf16 %v223_v22, %v219_v21  ;;  %502 = vmatprep.subr.bf16.mxu0 %v501_v19  ;;  %v511_v26 = vpack.c.bf16 %v225_v25, %v221_v23 }
  0x18   : > { %510 = vmatprep.subr.bf16.mxu1 %v509_v20 }
  0x1a   : > { %504 = vmatpush1.bf16.msra.mxu0 %v503_v24 }
  0x1b   : > { %512 = vmatpush1.bf16.msra.mxu1 %v511_v26 }
  0x1d   : > { %491 = vmatmul.mubr.msk.f32.vlgmr.msra.gmra.mrb[0].mxu0 %vm233_vm0, %v210_v27 }
  0x1e   : > { %492 = vmatmul.mubr.msk.f32.vlgmr.msra.gmra.mrb[0].mxu1 %vm233_vm0, %v210_v27 }
  0x88   : > { %v231_v28 = vpop.permute.xlu0 %230 }
  0xf0   : > { %v303_v29 = vpop.f32.mrb[0].mxu0 }
  0xf1   : > { %v304_v30 = vadd.f32 %v303_v29, %v231_v28  ;;  %v374_v31 = vpop.f32.mrb[0].mxu1  ;;  %v305_v32 = vpop.f32.mrb[1].mxu0 }
  0xf2   : > { %v375_v33 = vadd.f32 %v374_v31, %v231_v28  ;;  %v306_v34 = vadd.f32 %v305_v32, %v231_v28  ;;  %v376_v35 = vpop.f32.mrb[1].mxu1 }
  0xf3   : > { %vm379_vm1 = vcmp.gt.f32.partialorder %v304_v30, 0.0  ;;  %v383_v36 = vmul.f32 0.15, %v304_v30  ;;  %v377_v37 = vadd.f32 %v376_v35, %v231_v28 }
  0xf4   : > { %vm381_vm2 = vcmp.gt.f32.partialorder %v375_v33, 0.0  ;;  %v385_v38 = vmul.f32 0.15, %v375_v33  ;;  %vm380_vm3 = vcmp.gt.f32.partialorder %v306_v34, 0.0  ;;  %v384_v39 = vmul.f32 0.15, %v306_v34 }
  0xf5   : > { %v387_v40 = vsel %vm379_vm1, %v304_v30, %v383_v36  ;;  %vm382_vm4 = vcmp.gt.f32.partialorder %v377_v37, 0.0  ;;  %v386_v41 = vmul.f32 0.15, %v377_v37 }
  0xf6   : > { %391 = vst [vmem:[%s208_s27] sm:$0xff] %v387_v40  ;;  %v389_v42 = vsel %vm381_vm2, %v375_v33, %v385_v38  ;;  %v388_v43 = vsel %vm380_vm3, %v306_v34, %v384_v39 }
  0xf7   : > { %393 = vst [vmem:[%s208_s27 + $0x10] sm:$0xff] %v389_v42  ;;  %392 = vst [vmem:[%s208_s27 + $0x8] sm:$0xff] %v388_v43  ;;  %v390_v44 = vsel %vm382_vm4, %v377_v37, %v386_v41 }
  0xf8   : > { %394 = vst [vmem:[%s208_s27 + $0x18] sm:$0xff] %v390_v44 }
  0xf9 PF: > { %s13_s14 = sadd.s32 1, %s562_s14   ;;  %s633_s12 = smov %s558_s13 }
  0xfa   : > { %p10_p5 = scmp.ge.s32.totalorder %s13_s14, 4   ;;  %s634_s13 = smov %s636_s15 }
  0xfc   :  { %12 = sbr.rel (!%p10_p5) target bundleno = 2 (0x2), region = 62 }

</bundles_post_ra>
